<compile_context>
chip_gen: v7x
topology: tpu7x:2x2x1
jax: 0.10.0
libtpu: 0.0.40
codegen_flags: <defaults>
</compile_context>

<pallas_src>
import functools

import jax
import jax.numpy as jnp
from jax.experimental import pallas as pl
from jax.experimental.pallas import tpu as pltpu


def _ce_kernel(pred_ref, tgt_ref, loss_ref):
    # pred_ref: (tm, C) native dtype; tgt_ref: (tm, 1) int32; loss_ref: (tm, 1) f32
    x = pred_ref[...].astype(jnp.float32)                        # (tm, C)
    m = jnp.max(x, axis=-1, keepdims=True)                       # (tm, 1)  XLU
    # Denominator: exp streams straight into the lane reduction; the full
    # (tm, C) exp tile is never needed anywhere else.
    s = jnp.sum(jnp.exp(x - m), axis=-1, keepdims=True)          # (tm, 1)  EUP+XLU
    # Gather the target logit with a one-hot mask built from a (1, C) iota
    # (never materialize a (tm, C) int32 iota).
    col = jax.lax.broadcasted_iota(jnp.int32, (1, x.shape[1]), 1)  # (1, C)
    tgt = tgt_ref[...]                                            # (tm, 1) int32
    # -inf fill keeps out-of-range targets behaving exactly like
    # jax.nn.one_hot (all-zero row -> p_t = 0 -> loss = -log(1e-10)).
    x_t = jnp.max(jnp.where(col == tgt, x, -jnp.inf),
                  axis=-1, keepdims=True)                         # (tm, 1)
    # exp(x_t - m) is bit-identical to the target element of exp(x - m), so
    # p_t == softmax(x)[row, target] exactly; one divide + one log PER ROW.
    p_t = jnp.exp(x_t - m) / s
    # TODO(synk): on v6e/v7x, if a bundle dump shows the f32 exp saturating the
    # EUP slot once DMA is hidden, switch the row exp to bf16 with an f32
    # accumulation (numerics change slightly, so gate on measurement).
    loss_ref[...] = (-jnp.log(p_t + 1e-10)).astype(loss_ref.dtype)


def _round_up(x, m):
    return ((x + m - 1) // m) * m


def _plan(n_rows, n_classes, itemsize, block_rows=None):
    """Generation-aware row-tile size and scoped-VMEM limit."""
    try:
        vmem_cap = int(pltpu.get_tpu_info().vmem_capacity_bytes)
    except Exception:
        vmem_cap = 64 * 1024 * 1024            # conservative: v7x per-core VMEM
    if vmem_cap >= 100 * 1024 * 1024:          # v5e / v6e: 128 MiB VMEM
        tile_target = 8 * 1024 * 1024          # native prediction bytes / step
        budget = 80 * 1024 * 1024              # working-set budget
        limit_cap = 96 * 1024 * 1024
    else:                                      # v7x: 64 MiB per TensorCore
        tile_target = 4 * 1024 * 1024
        budget = 36 * 1024 * 1024
        limit_cap = 48 * 1024 * 1024

    # Per-row VMEM working set:
    #   * double-buffered native prediction tile       : 2 * C * itemsize
    #   * f32 intermediates (x, select, streamed exp)  : 3 * C * 4 (generous)
    #   * (tm, 1) target / loss blocks pad the lane dim to 128 in VMEM:
    #     4 buffers (in + out, double-buffered) * 128 * 4 bytes.
    row_bytes = 2 * n_classes * itemsize + 3 * n_classes * 4 + 4 * 128 * 4

    if block_rows is None:
        tm = min(tile_target // max(1, n_classes * itemsize),
                 max(8, budget // row_bytes))
        tm = max(8, (tm // 8) * 8)             # sublane granularity, no 4096 clamp
    else:
        tm = max(8, (int(block_rows) // 8) * 8)
    tm = min(tm, _round_up(n_rows, 8))         # never allocate past the row count

    est = tm * row_bytes * 3 // 2 + 4 * 1024 * 1024
    vmem_limit = int(min(limit_cap, max(32 * 1024 * 1024, est)))
    return tm, vmem_limit


@functools.partial(jax.jit, static_argnames=("block_rows",))
def custom_cross_entropy_loss(predictions, targets, block_rows=None):
    """predictions: (B, T, C) float; targets: (B, T) int.  Returns (B*T,) f32."""
    B, T, C = predictions.shape
    N = B * T
    # Free reshapes only -- the (N, C) predictions are NEVER padded or copied
    # on the host: the grid uses cdiv and the last block is partial; its tail
    # rows live only inside the kernel tile and are masked on store.
    preds2d = predictions.reshape(N, C)                 # keep native dtype
    tgts2d = targets.reshape(N, 1).astype(jnp.int32)

    tm, vmem_limit = _plan(N, C, preds2d.dtype.itemsize, block_rows)
    grid = (pl.cdiv(N, tm),)

    out = pl.pallas_call(
        _ce_kernel,
        out_shape=jax.ShapeDtypeStruct((N, 1), jnp.float32),
        grid_spec=pltpu.PrefetchScalarGridSpec(
            num_scalar_prefetch=0,
            grid=grid,
            in_specs=[
                pl.BlockSpec((tm, C), lambda i: (i, 0)),
                # TODO(synk): lane-dense (1, tm) target/loss blocks (targets
                # reshaped to (n_tiles, tm) on the host) would remove the 128x
                # VMEM lane padding of these (tm, 1) blocks and give unmasked,
                # contiguous stores; it requires an in-kernel (1,tm)<->(tm,1)
                # relayout of the per-row scalars, deferred until that
                # relayout is validated on all three generations.  The padded
                # footprint is charged in _plan, so it bounds tile size rather
                # than overflowing VMEM (it only dominates for very small C).
                pl.BlockSpec((tm, 1), lambda i: (i, 0)),
            ],
            out_specs=pl.BlockSpec((tm, 1), lambda i: (i, 0)),
        ),
        compiler_params=pltpu.CompilerParams(
            # "parallel" is the documented megacore-sharding hint; a no-op on
            # single-TensorCore v5e/v6e.
            # TODO(synk): on v7x (2 TCs sharing HBM) evaluate
            # pltpu.CORE_PARALLEL on this axis and confirm ~2x on this
            # HBM-bound kernel before switching unconditionally.
            dimension_semantics=("parallel",),
            vmem_limit_bytes=vmem_limit,
        ),
        # TODO(synk): if an xprof trace still shows exposed DMA gaps after the
        # larger tiles, try pipeline_mode=pl.Buffered(3) on the predictions
        # BlockSpec (costs one extra tile of VMEM, so v7x budget must allow it).
    )(preds2d, tgts2d)

    return out[:, 0]


def _reference(predictions, targets):
    B, T, C = predictions.shape
    x = predictions.reshape(B * T, C).astype(jnp.float32)
    t = targets.reshape(-1)
    p = jax.nn.softmax(x, axis=1)
    one_hot = jax.nn.one_hot(t, C, dtype=jnp.float32)
    return -jnp.sum(one_hot * jnp.log(p + 1e-10), axis=1)


if __name__ == "__main__":
    key = jax.random.PRNGKey(0)
    k1, k2, k3, k4, k5, k6 = jax.random.split(key, 6)

    # 1) Small shape implied by the module: B=2, T=8, C=32 (single full tile).
    B, T, C = 2, 8, 32
    predictions = jax.random.normal(k1, (B, T, C), dtype=jnp.float32)
    targets = jax.random.randint(k2, (B, T), 0, C, dtype=jnp.int32)
    loss = custom_cross_entropy_loss(predictions, targets)
    jax.block_until_ready(loss)
    ref = _reference(predictions, targets)
    assert loss.shape == (B * T,)
    assert jnp.allclose(loss, ref, atol=1e-5, rtol=1e-5), (loss, ref)

    # 2) Partial last block (N % tm != 0) exercising the no-pad cdiv path:
    #    N = 150 rows, forced block_rows=32 -> 5 blocks, last block has 22 rows.
    B2, T2, C2 = 3, 50, 384
    preds2 = jax.random.normal(k3, (B2, T2, C2), dtype=jnp.float32)
    tgts2 = jax.random.randint(k4, (B2, T2), 0, C2, dtype=jnp.int32)
    loss2 = custom_cross_entropy_loss(preds2, tgts2, block_rows=32)
    jax.block_until_ready(loss2)
    ref2 = _reference(preds2, tgts2)
    assert loss2.shape == (B2 * T2,)
    assert jnp.allclose(loss2, ref2, atol=1e-5, rtol=1e-5), (loss2, ref2)

    # 3) bf16 predictions stream in native dtype and are upcast in-kernel.
    B3, T3, C3 = 2, 16, 256
    preds3 = jax.random.normal(k5, (B3, T3, C3), dtype=jnp.bfloat16)
    tgts3 = jax.random.randint(k6, (B3, T3), 0, C3, dtype=jnp.int32)
    loss3 = custom_cross_entropy_loss(preds3, tgts3)
    jax.block_until_ready(loss3)
    ref3 = _reference(preds3, tgts3)
    assert loss3.shape == (B3 * T3,)
    assert jnp.allclose(loss3, ref3, atol=1e-4, rtol=1e-4), (loss3, ref3)

    print("KERNEL_OK")
</pallas_src>

<mosaic_0001>
module attributes {stable_mosaic.version = 11 : i64} {
  func.func @_ce_kernel(%arg0: i32, %arg1: memref<16x32xf32, #tpu.memory_space<vmem>>, %arg2: memref<16x1xi32, #tpu.memory_space<vmem>>, %arg3: memref<16x1xf32, #tpu.memory_space<vmem>>) attributes {dimension_semantics = [#tpu.dimension_semantics<parallel>], iteration_bounds = array<i64: 1>, scalar_prefetch = 0 : i64, scratch_operands = 0 : i64, tpu.core_type = #tpu.core_type<tc>, window_params = [{transform_indices = @transform_0, window_bounds = array<i64: 16, 32>}, {transform_indices = @transform_1, window_bounds = array<i64: 16, 1>}, {transform_indices = @transform_2, window_bounds = array<i64: 16, 1>}]} {
    %c0 = arith.constant 0 : index
    %c0_0 = arith.constant 0 : index
    %0 = vector.load %arg1[%c0, %c0_0] : memref<16x32xf32, #tpu.memory_space<vmem>>, vector<16x32xf32>
    %cst = arith.constant dense<0xFF800000> : vector<16xf32>
    %1 = vector.multi_reduction <maximumf>, %0, %cst [1] : vector<16x32xf32> to vector<16xf32>
    %2 = vector.shape_cast %1 : vector<16xf32> to vector<16x1xf32>
    %3 = vector.broadcast %2 : vector<16x1xf32> to vector<16x32xf32>
    %4 = arith.subf %0, %3 : vector<16x32xf32>
    %5 = math.exp %4 : vector<16x32xf32>
    %cst_1 = arith.constant dense<0.000000e+00> : vector<16xf32>
    %6 = vector.multi_reduction <add>, %5, %cst_1 [1] : vector<16x32xf32> to vector<16xf32>
    %7 = vector.shape_cast %6 : vector<16xf32> to vector<16x1xf32>
    %8 = tpu.iota {dimensions = array<i32: 1>} : vector<1x32xi32>
    %c0_2 = arith.constant 0 : index
    %c0_3 = arith.constant 0 : index
    %9 = vector.load %arg2[%c0_2, %c0_3] : memref<16x1xi32, #tpu.memory_space<vmem>>, vector<16x1xi32>
    %10 = vector.broadcast %8 : vector<1x32xi32> to vector<16x32xi32>
    %11 = vector.broadcast %9 : vector<16x1xi32> to vector<16x32xi32>
    %12 = arith.cmpi eq, %10, %11 : vector<16x32xi32>
    %cst_4 = arith.constant 0xFF800000 : f32
    %13 = vector.broadcast %cst_4 : f32 to vector<16x32xf32>
    %14 = arith.select %12, %0, %13 : vector<16x32xi1>, vector<16x32xf32>
    %cst_5 = arith.constant dense<0xFF800000> : vector<16xf32>
    %15 = vector.multi_reduction <maximumf>, %14, %cst_5 [1] : vector<16x32xf32> to vector<16xf32>
    %16 = vector.shape_cast %15 : vector<16xf32> to vector<16x1xf32>
    %17 = arith.subf %16, %2 : vector<16x1xf32>
    %18 = math.exp %17 : vector<16x1xf32>
    %19 = arith.divf %18, %7 : vector<16x1xf32>
    %cst_6 = arith.constant 1.000000e-10 : f32
    %20 = vector.broadcast %cst_6 : f32 to vector<16x1xf32>
    %21 = arith.addf %19, %20 : vector<16x1xf32>
    %22 = math.log %21 : vector<16x1xf32>
    %cst_7 = arith.constant 0.000000e+00 : f32
    %23 = vector.broadcast %cst_7 : f32 to vector<16x1xf32>
    %24 = arith.subf %23, %22 : vector<16x1xf32>
    %c0_8 = arith.constant 0 : index
    %c0_9 = arith.constant 0 : index
    %25 = vector.load %arg3[%c0_8, %c0_9] : memref<16x1xf32, #tpu.memory_space<vmem>>, vector<16x1xf32>
    tpu.vector_store %arg3[%c0_8, %c0_9], %24 {strides = array<i32>} : memref<16x1xf32, #tpu.memory_space<vmem>>, vector<16x1xf32>,
    return
  }
  func.func @transform_0(%arg0: i32) -> (i32, i32) {
    %c0_i32 = arith.constant 0 : i32
    %c0_i32_0 = arith.constant 0 : i32
    return %arg0, %c0_i32 : i32, i32
  }
  func.func @transform_1(%arg0: i32) -> (i32, i32) {
    %c0_i32 = arith.constant 0 : i32
    %c0_i32_0 = arith.constant 0 : i32
    return %arg0, %c0_i32 : i32, i32
  }
  func.func @transform_2(%arg0: i32) -> (i32, i32) {
    %c0_i32 = arith.constant 0 : i32
    %c0_i32_0 = arith.constant 0 : i32
    return %arg0, %c0_i32 : i32, i32
  }
}

</mosaic_0001>

<bundles_post_ra>
// kernel: custom_cross_entropy_loss.1
= control target key start
LH: loop header
LB: loop body
LE: loop exit
PB: predicated region body
PF: predicated region fallthrough
CT: control target
= control target key end

     0   :  { %vm13_vm0 = vcmask 261120   ;;  %v96_v0 = vmov 0   ;;  %v32_v7 = vlaneseq  ;;  %vm70_vm3 = vcmask 7168   ;;  %s136_s1 = inlined_call_operand.vmem [shape: s32[16,1], index: 1, kind: input, shape index: {}]   ;;  %s137_s0 = inlined_call_operand.vmem [shape: f32[16,32], index: 0, kind: input, shape index: {}]   ;;  %s138_s2 = inlined_call_operand.vmem [shape: f32[16,1], index: 2, kind: output, shape index: {}]  }
   0x1   :  { %78 = vset.pattern.permute.xlu1 %v96_v0  ;;  %v34_v1 = vld [vmem:[%s136_s1] sm:$0xff]  ;;  %79 = vset.pattern.permute.xlu0 %v96_v0  ;;  %v12_v4 = vld [vmem:[%s137_s0 + $0x8] sm:$0xff] }
   0x2   :  { %v11_v2 = vld [vmem:[%s137_s0] sm:$0xff]  ;;  %37 = vperm.xlu1 %78, %v34_v1   ;;  %v35_v5 = vld [vmem:[%s136_s1 + $0x8] sm:$0xff]  ;;  %v17_v6 = vsel %vm13_vm0, %v12_v4, -inf  ;;  %v33_v8 = vand.u32 127, %v32_v7 }
   0x3   :  { %v14_v3 = vsel %vm13_vm0, %v11_v2, -inf }
   0x4   :  { %15 = vmax.xlane.f32.xlu0 %v14_v3 }
   0x6   :  { %40 = vperm.xlu1 %78, %v35_v5  }
   0x8   :  { %18 = vmax.xlane.f32.xlu0 %v17_v6 }
  0x81   :  { %v38_v9 = vpop.permute.xlu1 %37 }
  0x82   :  { %vm42_vm1 = vcmp.eq.s32.totalorder %v33_v8, %v38_v9 }
  0x83   :  { %v44_v10 = vsel %vm42_vm1, %v11_v2, -inf }
  0x84   :  { %v46_v11 = vsel %vm13_vm0, %v44_v10, -inf }
  0x85   :  { %v41_v12 = vpop.permute.xlu1 %40  ;;  %47 = vmax.xlane.f32.xlu0 %v46_v11 }
  0x86   :  { %vm43_vm2 = vcmp.eq.s32.totalorder %v33_v8, %v41_v12 }
  0x87   :  { %v45_v13 = vsel %vm43_vm2, %v12_v4, -inf }
  0x88   :  { %v49_v14 = vsel %vm13_vm0, %v45_v13, -inf }
  0x89   :  { %50 = vmax.xlane.f32.xlu1 %v49_v14 }
  0x91   :  { %v16_v15 = vpop.xlane.xlu0 %15 }
  0x92   :  { %v20_v16 = vsub.f32 %v11_v2, %v16_v15 }
  0x94   :  { %v22_v17 = vmul.f32 1.442695, %v20_v16 }
  0x95   :  { %v19_v18 = vpop.xlane.xlu0 %18 }
  0x96   :  { %80 = vpow2.f32 %v22_v17  ;;  %v21_v19 = vsub.f32 %v12_v4, %v19_v18 }
  0x98   :  { %v24_v20 = vmul.f32 1.442695, %v21_v19 }
  0x9a   :  { %82 = vpow2.f32 %v24_v20 }
  0xa0   :  { %v81_v21 = vpop.eup %80 }
  0xa1   :  { %v26_v22 = vsel %vm13_vm0, %v81_v21, 0.0 }
  0xa2   :  { %27 = vadd.xlane.f32.xlu0 %v26_v22 }
  0xa4   :  { %v83_v23 = vpop.eup %82 }
  0xa5   :  { %v29_v24 = vsel %vm13_vm0, %v83_v23, 0.0 }
  0xa6   :  { %30 = vadd.xlane.f32.xlu0 %v29_v24 }
 0x112   :  { %v48_v25 = vpop.xlane.xlu0 %47 }
 0x113   :  { %v52_v26 = vsub.f32 %v48_v25, %v16_v15 }
 0x115   :  { %v54_v28 = vmul.f32 1.442695, %v52_v26 }
 0x116   :  { %v51_v27 = vpop.xlane.xlu1 %50 }
 0x117   :  { %v53_v29 = vsub.f32 %v51_v27, %v19_v18  ;;  %84 = vpow2.f32 %v54_v28 }
 0x119   :  { %v56_v30 = vmul.f32 1.442695, %v53_v29 }
 0x121   :  { %v85_v33 = vpop.eup %84 }
 0x12f   :  { %v28_v31 = vpop.xlane.xlu0 %27 }
 0x130   :  { %86 = vrcp.f32 %v28_v31 }
 0x131   :  { %88 = vpow2.f32 %v56_v30 }
 0x133   :  { %v31_v32 = vpop.xlane.xlu0 %30 }
 0x134   :  { %90 = vrcp.f32 %v31_v32 }
 0x13a   :  { %v87_v34 = vpop.eup %86 }
 0x13b   :  { %v59_v35 = vmul.f32 %v87_v34, %v85_v33  ;;  %v89_v36 = vpop.eup %88 }
 0x13d   :  { %v62_v37 = vadd.f32 1e-10, %v59_v35 }
 0x13e   :  { %v91_v38 = vpop.eup %90 }
 0x13f   :  { %92 = vlog2.f32 %v62_v37  ;;  %v61_v39 = vmul.f32 %v91_v38, %v89_v36 }
 0x141   :  { %v63_v40 = vadd.f32 1e-10, %v61_v39 }
 0x143   :  { %94 = vlog2.f32 %v63_v40 }
 0x149   :  { %v93_v41 = vpop.eup %92 }
 0x14a   :  { %v65_v42 = vmul.f32 0.6931472, %v93_v41 }
 0x14c   :  { %v68_v43 = vsub.f32 0.0, %v65_v42 }
 0x14d   :  { %v95_v44 = vpop.eup %94 }
 0x14e   :  { %71 = vst.msk [vmem:[%s138_s2] sm:$0xff] %vm70_vm3, %v68_v43  ;;  %v67_v45 = vmul.f32 0.6931472, %v95_v44 }
 0x150   :  { %v69_v46 = vsub.f32 0.0, %v67_v45 }
 0x152   :  { %72 = vst.msk [vmem:[%s138_s2 + $0x8] sm:$0xff] %vm70_vm3, %v69_v46 }

</bundles_post_ra>
